<compile_context>
chip_gen: v7x
topology: tpu7x:2x2x1
jax: 0.10.0
libtpu: 0.0.40
codegen_flags: <defaults>
</compile_context>

<pallas_src>
import math

import jax
import jax.numpy as jnp
from jax.experimental import pallas as pl
from jax.experimental.pallas import tpu as pltpu


def _attention_kernel(x_ref, wenc_ref, hbias_ref, v_ref, o_ref):
    """One grid step processes TB batch elements.

    x_ref:     (TB*L, 2H)  encoder_output rows (compute dtype, e.g. bf16)
    wenc_ref:  (2H, H)     encoder half of attn.weight.T (compute dtype)
    hbias_ref: (TB, H)     per-batch bias = hidden @ W_hid.T + attn.bias  (f32)
    v_ref:     (1, H)      v.weight                                       (f32)
    o_ref:     (TB, L)     softmax attention weights, lane-dense in L     (f32)
    """
    TB, L = o_ref.shape
    H = wenc_ref.shape[1]

    # Single MXU matmul with M = TB*L rows, K = 2H, f32 accumulation.
    acc = jnp.dot(x_ref[...], wenc_ref[...],
                  preferred_element_type=jnp.float32)          # (TB*L, H) f32

    # Add the per-batch (hidden) bias and apply tanh in f32 (EUP/VPU).
    energy = jnp.tanh(acc.reshape(TB, L, H)
                      + hbias_ref[...][:, None, :])            # (TB, L, H)

    # Width-1 projection as VPU multiply + lane (XLU) reduction.
    scores = jnp.sum(energy * v_ref[...], axis=-1)             # (TB, L)

    # Row-wise softmax over L (never crosses batch rows).
    m = jnp.max(scores, axis=-1, keepdims=True)                # (TB, 1)
    e = jnp.exp(scores - m)
    o_ref[...] = (e / jnp.sum(e, axis=-1, keepdims=True)).astype(o_ref.dtype)


def _pick_batch_tile(B, L, bytes_per_batch_elem, tile_budget_bytes=4 << 20):
    """Choose TB batch elements per grid step.

    Keeps the streamed input tile a few MiB (double-buffered; safe under v7x's
    64 MiB VMEM) while making the matmul M-dim (TB*L) large enough to fill the
    MXU.  BlockSpec sublane rule: TB must equal B or be a multiple of 8.
    """
    max_tb = max(1, tile_budget_bytes // max(1, bytes_per_batch_elem))
    if B <= max_tb:
        return B
    for tb in range(min(B, max_tb), 7, -1):
        if B % tb == 0 and tb % 8 == 0:
            return tb
    return B  # fallback: single big tile (correct, just less pipelined)


def attention_layer(hidden, encoder_output, w_attn, b_attn, w_v,
                    compute_dtype=jnp.bfloat16):
    """Pallas equivalent of AttentionLayer.forward.

    hidden:          (1, B, 2H)
    encoder_output:  (B, L, 2H)
    w_attn:          (H, 4H)   nn.Linear(4H, H).weight
    b_attn:          (H,)      nn.Linear(4H, H).bias
    w_v:             (1, H)    nn.Linear(H, 1, bias=False).weight
    returns:         (B, L)    softmax over L (float32)
    """
    B, L, H2 = encoder_output.shape
    H = w_attn.shape[0]
    assert w_attn.shape[1] == 2 * H2, "attn.weight must be (H, 4H)"

    # Split the weight: cat([hid, enc]) @ W.T == hid @ W_hid.T + enc @ W_enc.T
    w_hid = w_attn[:, :H2]                                     # (H, 2H)
    w_enc = w_attn[:, H2:]                                     # (H, 2H)

    # Tiny XLA matmul folded into a per-batch bias -> no (B, L, 4H) concat.
    hid = hidden[0].astype(jnp.float32)                        # (B, 2H)
    hid_bias = hid @ w_hid.T.astype(jnp.float32) \
        + b_attn.astype(jnp.float32)[None, :]                  # (B, H) f32

    # Stream encoder rows as a flat (B*L, 2H) slab (free row-major reshape).
    enc_flat = encoder_output.reshape(B * L, H2).astype(compute_dtype)
    w_enc_t = w_enc.T.astype(compute_dtype)                    # (2H, H)
    v_row = w_v.astype(jnp.float32)                            # (1, H)

    TB = _pick_batch_tile(B, L, L * H2 * enc_flat.dtype.itemsize)
    grid = (B // TB,)

    out = pl.pallas_call(
        _attention_kernel,
        out_shape=jax.ShapeDtypeStruct((B, L), jnp.float32),
        grid=grid,
        in_specs=[
            pl.BlockSpec((TB * L, H2), lambda bi: (bi, 0)),    # enc rows
            pl.BlockSpec((H2, H), lambda bi: (0, 0)),          # W_enc.T resident
            pl.BlockSpec((TB, H), lambda bi: (bi, 0)),         # per-batch bias
            pl.BlockSpec((1, H), lambda bi: (0, 0)),           # v resident
        ],
        out_specs=pl.BlockSpec((TB, L), lambda bi: (bi, 0)),   # lane-dense in L
        compiler_params=pltpu.CompilerParams(
            dimension_semantics=("parallel",),
            vmem_limit_bytes=32 << 20),
    )(enc_flat, w_enc_t, hid_bias, v_row)

    return out                                                 # (B, L)


def _reference(hidden, encoder_output, w_attn, b_attn, w_v):
    B, L, _ = encoder_output.shape
    hid = jnp.broadcast_to(
        jnp.transpose(hidden, (1, 0, 2)), (B, L, hidden.shape[-1]))
    cat = jnp.concatenate([hid, encoder_output], axis=2)
    energy = jnp.tanh(cat @ w_attn.T + b_attn)
    att = (energy @ w_v.T)[..., 0]
    return jax.nn.softmax(att, axis=1)


def _xavier_uniform(key, shape):
    # shape = (fan_out, fan_in) like nn.Linear.weight
    fan_out, fan_in = shape
    bound = math.sqrt(6.0 / (fan_in + fan_out))
    return jax.random.uniform(key, shape, jnp.float32, -bound, bound)


if __name__ == "__main__":
    hidden_size = 32        # H
    B, L = 2, 8
    H2, H4 = 2 * hidden_size, 4 * hidden_size

    key = jax.random.PRNGKey(0)
    k_w, k_v, k_h, k_e = jax.random.split(key, 4)

    # Deterministic parameter init (Xavier uniform weights, zero bias).
    w_attn = _xavier_uniform(k_w, (hidden_size, H4))     # attn.weight (H, 4H)
    b_attn = jnp.zeros((hidden_size,), jnp.float32)      # attn.bias
    w_v = _xavier_uniform(k_v, (1, hidden_size))         # v.weight (1, H)

    # Inputs: hidden (1, B, 2H), encoder_output (B, L, 2H)
    hidden = jax.random.normal(k_h, (1, B, H2), jnp.float32)
    encoder_output = jax.random.normal(k_e, (B, L, H2), jnp.float32)

    ref = _reference(hidden, encoder_output, w_attn, b_attn, w_v)

    # Exact path (f32 MXU feed): must match the f32 reference tightly.
    out_f32 = attention_layer(hidden, encoder_output, w_attn, b_attn, w_v,
                              compute_dtype=jnp.float32)
    out_f32 = jax.block_until_ready(out_f32)
    assert out_f32.shape == (B, L)
    assert jnp.allclose(out_f32, ref, atol=1e-5, rtol=1e-5), "f32 mismatch"

    # Fast path (bf16 MXU feed, f32 accumulation) — default for v6e/v7x.
    out_bf16 = attention_layer(hidden, encoder_output, w_attn, b_attn, w_v)
    out_bf16 = jax.block_until_ready(out_bf16)
    assert out_bf16.shape == (B, L)
    assert jnp.allclose(out_bf16, ref, atol=5e-2), "bf16 mismatch"

    print("KERNEL_OK")
</pallas_src>

<mosaic_0001>
module attributes {stable_mosaic.version = 11 : i64} {
  func.func @_attention_kernel(%arg0: i32, %arg1: memref<16x64xf32, #tpu.memory_space<vmem>>, %arg2: memref<64x32xf32, #tpu.memory_space<vmem>>, %arg3: memref<2x32xf32, #tpu.memory_space<vmem>>, %arg4: memref<1x32xf32, #tpu.memory_space<vmem>>, %arg5: memref<2x8xf32, #tpu.memory_space<vmem>>) attributes {dimension_semantics = [#tpu.dimension_semantics<parallel>], iteration_bounds = array<i64: 1>, scalar_prefetch = 0 : i64, scratch_operands = 0 : i64, tpu.core_type = #tpu.core_type<tc>, window_params = [{transform_indices = @transform_0, window_bounds = array<i64: 16, 64>}, {pipeline_mode = #tpu.pipeline_mode<synchronous>, transform_indices = @transform_1, window_bounds = array<i64: 64, 32>}, {transform_indices = @transform_2, window_bounds = array<i64: 2, 32>}, {pipeline_mode = #tpu.pipeline_mode<synchronous>, transform_indices = @transform_3, window_bounds = array<i64: 1, 32>}, {transform_indices = @transform_4, window_bounds = array<i64: 2, 8>}]} {
    %c0 = arith.constant 0 : index
    %c0_0 = arith.constant 0 : index
    %0 = vector.load %arg1[%c0, %c0_0] : memref<16x64xf32, #tpu.memory_space<vmem>>, vector<16x64xf32>
    %c0_1 = arith.constant 0 : index
    %c0_2 = arith.constant 0 : index
    %1 = vector.load %arg2[%c0_1, %c0_2] : memref<64x32xf32, #tpu.memory_space<vmem>>, vector<64x32xf32>
    %cst = arith.constant dense<0.000000e+00> : vector<16x32xf32>
    %2 = tpu.matmul %0, %1, %cst {dimension_numbers = #tpu.dot_dimension_numbers<[1], [0], [0], [1], [0, 0, 1, 1], [], []>} : vector<16x64xf32>, vector<64x32xf32>, vector<16x32xf32> -> vector<16x32xf32>
    %3 = vector.shape_cast %2 : vector<16x32xf32> to vector<2x8x32xf32>
    %c0_3 = arith.constant 0 : index
    %c0_4 = arith.constant 0 : index
    %4 = vector.load %arg3[%c0_3, %c0_4] : memref<2x32xf32, #tpu.memory_space<vmem>>, vector<2x32xf32>
    %5 = vector.shape_cast %4 : vector<2x32xf32> to vector<2x1x32xf32>
    %6 = vector.broadcast %5 : vector<2x1x32xf32> to vector<2x8x32xf32>
    %7 = arith.addf %3, %6 : vector<2x8x32xf32>
    %8 = math.tanh %7 : vector<2x8x32xf32>
    %c0_5 = arith.constant 0 : index
    %c0_6 = arith.constant 0 : index
    %9 = vector.load %arg4[%c0_5, %c0_6] : memref<1x32xf32, #tpu.memory_space<vmem>>, vector<1x32xf32>
    %10 = vector.shape_cast %9 : vector<1x32xf32> to vector<1x1x32xf32>
    %11 = vector.broadcast %10 : vector<1x1x32xf32> to vector<2x8x32xf32>
    %12 = arith.mulf %8, %11 : vector<2x8x32xf32>
    %cst_7 = arith.constant dense<0.000000e+00> : vector<2x8xf32>
    %13 = vector.multi_reduction <add>, %12, %cst_7 [2] : vector<2x8x32xf32> to vector<2x8xf32>
    %cst_8 = arith.constant dense<0xFF800000> : vector<2xf32>
    %14 = vector.multi_reduction <maximumf>, %13, %cst_8 [1] : vector<2x8xf32> to vector<2xf32>
    %15 = vector.shape_cast %14 : vector<2xf32> to vector<2x1xf32>
    %16 = vector.broadcast %15 : vector<2x1xf32> to vector<2x8xf32>
    %17 = arith.subf %13, %16 : vector<2x8xf32>
    %18 = math.exp %17 : vector<2x8xf32>
    %cst_9 = arith.constant dense<0.000000e+00> : vector<2xf32>
    %19 = vector.multi_reduction <add>, %18, %cst_9 [1] : vector<2x8xf32> to vector<2xf32>
    %20 = vector.shape_cast %19 : vector<2xf32> to vector<2x1xf32>
    %21 = vector.broadcast %20 : vector<2x1xf32> to vector<2x8xf32>
    %22 = arith.divf %18, %21 : vector<2x8xf32>
    %c0_10 = arith.constant 0 : index
    %c0_11 = arith.constant 0 : index
    %23 = vector.load %arg5[%c0_10, %c0_11] : memref<2x8xf32, #tpu.memory_space<vmem>>, vector<2x8xf32>
    tpu.vector_store %arg5[%c0_10, %c0_11], %22 {strides = array<i32>} : memref<2x8xf32, #tpu.memory_space<vmem>>, vector<2x8xf32>,
    return
  }
  func.func @transform_0(%arg0: i32) -> (i32, i32) {
    %c0_i32 = arith.constant 0 : i32
    %c0_i32_0 = arith.constant 0 : i32
    return %arg0, %c0_i32 : i32, i32
  }
  func.func @transform_1(%arg0: i32) -> (i32, i32) {
    %c0_i32 = arith.constant 0 : i32
    %c0_i32_0 = arith.constant 0 : i32
    %c0_i32_1 = arith.constant 0 : i32
    return %c0_i32, %c0_i32_0 : i32, i32
  }
  func.func @transform_2(%arg0: i32) -> (i32, i32) {
    %c0_i32 = arith.constant 0 : i32
    %c0_i32_0 = arith.constant 0 : i32
    return %arg0, %c0_i32 : i32, i32
  }
  func.func @transform_3(%arg0: i32) -> (i32, i32) {
    %c0_i32 = arith.constant 0 : i32
    %c0_i32_0 = arith.constant 0 : i32
    %c0_i32_1 = arith.constant 0 : i32
    return %c0_i32, %c0_i32_0 : i32, i32
  }
  func.func @transform_4(%arg0: i32) -> (i32, i32) {
    %c0_i32 = arith.constant 0 : i32
    %c0_i32_0 = arith.constant 0 : i32
    return %arg0, %c0_i32 : i32, i32
  }
}

</mosaic_0001>

<bundles_post_ra>
// kernel: tpu_custom_call.1
= control target key start
LH: loop header
LB: loop body
LE: loop exit
PB: predicated region body
PF: predicated region fallthrough
CT: control target
= control target key end

     0   :  { %vm28_vm0 = vcmask 523264   ;;  %s449_s0 = inlined_call_operand.vmem [shape: f32[16,64], index: 0, kind: input, shape index: {}]   ;;  %s450_s1 = inlined_call_operand.vmem [shape: f32[64,32], index: 1, kind: input, shape index: {}]   ;;  %s451_s2 = inlined_call_operand.vmem [shape: f32[2,32], index: 2, kind: input, shape index: {}]   ;;  %s452_s3 = inlined_call_operand.vmem [shape: f32[1,32], index: 3, kind: input, shape index: {}]   ;;  %s453_s4 = inlined_call_operand.hbm [shape: f32[2,8], index: 4, kind: output, shape index: {}]  }
   0x1   :  { %v20_v0 = vld [vmem:[%s450_s1] sm:$0xff]  ;;  %v21_v1 = vld [vmem:[%s450_s1 + $0x8] sm:$0xff]  ;;  %v22_v2 = vld [vmem:[%s450_s1 + $0x10] sm:$0xff] }
   0x2   :  { %v302_v3 = vpack.c.bf16 %v21_v1, %v20_v0  ;;  %v23_v4 = vld [vmem:[%s450_s1 + $0x18] sm:$0xff]  ;;  %v24_v6 = vld [vmem:[%s450_s1 + $0x20] sm:$0xff]  ;;  %v25_v7 = vld [vmem:[%s450_s1 + $0x28] sm:$0xff] }
   0x3   :  { %v306_v5 = vpack.c.bf16 %v23_v4, %v22_v2  ;;  %v18_v8 = vld [vmem:[%s449_s0] sm:$0xff] }
   0x4   :  { %303 = vmatprep.subr.bf16.mxu0 %v302_v3  ;;  %299 = vmatprep.mubr.msk.f32.mxu0 %vm28_vm0, %v18_v8 }
   0x5   :  { %9 = vsyncpa [#allocation3], 0  ;;  %305 = vmatpush3.bf16.msra.mxu0 %v302_v3  ;;  %v310_v9 = vpack.c.bf16 %v25_v7, %v24_v6  ;;  %v26_v10 = vld [vmem:[%s450_s1 + $0x30] sm:$0xff]  ;;  %v27_v11 = vld [vmem:[%s450_s1 + $0x38] sm:$0xff]  ;;  %v359_v14 = vmov 1966171168   ;;  %v123_v16 = vlaneseq }
   0x6   :  { %307 = vmatprep.subr.bf16.mxu0 %v306_v5  ;;  %v314_v12 = vpack.c.bf16 %v27_v11, %v26_v10  ;;  %v19_v13 = vld [vmem:[%s449_s0 + $0x8] sm:$0xff]  ;;  %v121_v15 = vunpack.c.l.s4 %v359_v14  ;;  %v271_v19 = vld.sshfl [vmem:[%s451_s2] sm:$0x11 pattern:$0x75316420]  ;;  %vm157_vm1 = vcmask 261120  }
   0x7   :  { %v419_v18 = vshrl.u32 %v123_v16, 7  ;;  %v119_v20 = vcombine.high %v271_v19, %v271_v19  ;;  %v272_v31 = vld [vmem:[%s452_s3] ss:$0 sm:$0xff]  ;;  %v167_v38 = vand.u32 127, %v123_v16  ;;  %vm176_vm2 = vcmask 1041409   ;;  %s361_s2 = smov [#allocation2]  }
   0x8   :  { %v122_v17 = vunpack.c.0.s8 %v121_v15  ;;  %vm179_vm3 = vcmask 58368   ;;  %v360_v46 = vmov 0   ;;  %s261_s3 = sshll.u32 %s361_s2, 4  ;;  %s262_s3 = int_to_ptr.vmem [resolvable:$true] %s261_s3 }
   0x9   :  { %309 = vmatpush3.bf16.msra.mxu0 %v306_v5  ;;  %v136_v23 = vsub.s32 0, %v419_v18  ;;  %v170_v40 = vsub.s32 %v167_v38, %v419_v18  ;;  %322 = vset.pattern.permute.xlu0 %v360_v46  ;;  %v190_v47 = vsub.s32 1, %v419_v18  ;;  %s335_s11 = scalar_lea.vmem %s262_s3, 32  ;;  %p340_p1 = scmp.lt.s32.totalorder %s262_s3, %s262_s3 }
   0xa   :  { %311 = vmatprep.subr.bf16.mxu0 %v310_v9  ;;  %v125_v21 = vsub.s32 %v122_v17, %v419_v18  ;;  %321 = vset.pattern.permute.xlu1 %v360_v46  ;;  %p336_p0 = scmp.ne.s32.totalorder %s262_s3, %s335_s11  ;;  %p341_p2 = scmp.lt.s32.totalorder %s335_s11, %s335_s11 }
   0xc   :  { %v133_v22 = vrot.slane %v119_v20, %v125_v21  ;;  %v126_v24 = vrot.slane %v271_v19, %v125_v21  ;;  %p342_p3 = por %p341_p2, %p340_p1 }
   0xd   :  { %313 = vmatpush3.bf16.msra.mxu0 %v310_v9 }
   0xe   :  { %315 = vmatprep.subr.bf16.mxu0 %v314_v12  ;;  %v141_v25 = vrot.slane %v133_v22, %v136_v23  ;;  %v137_v26 = vrot.slane %v126_v24, %v136_v23  ;;  %p343_p4 = pnand %p342_p3, %p336_p0 }
  0x11   :  { %317 = vmatpush3.bf16.msra.mxu0 %v314_v12 }
  0x14   :  { %300 = vmatmul.mubr.msk.f32.vlgmr.msra.gmra.mrb[0].mxu0 %vm28_vm0, %v19_v13 }
  0xe7   :  { %v301_v27 = vpop.f32.mrb[0].mxu0 }
  0xe8   :  { %v145_v28 = vadd.f32 %v301_v27, %v141_v25  ;;  %v101_v29 = vpop.f32.mrb[1].mxu0 }
  0xe9   :  { %v144_v30 = vadd.f32 %v137_v26, %v101_v29 }
  0xea   :  { %323 = vtanh.f32 %v145_v28 }
  0xeb   :  { %325 = vtanh.f32 %v144_v30 }
  0xf4   :  { %v324_v32 = vpop.eup %323 }
  0xf5   :  { %v326_v33 = vpop.eup %325  ;;  %v156_v36 = vmul.f32 %v324_v32, %v272_v31 }
  0xf6   :  { %v155_v34 = vmul.f32 %v326_v33, %v272_v31 }
  0xf7   :  { %v161_v37 = vsel %vm157_vm1, %v156_v36, 0.0 }
  0xf8   :  { %v158_v35 = vsel %vm157_vm1, %v155_v34, 0.0 }
  0xf9   :  { %159 = vadd.xlane.f32.xlu0 %v158_v35 }
  0xfd   :  { %162 = vadd.xlane.f32.xlu0 %v161_v37 }
 0x186   :  { %v160_v39 = vpop.xlane.xlu0 %159 }
 0x187   :  { %v171_v42 = vrot.slane %v160_v39, %v170_v40 }
 0x18a   :  { %v163_v41 = vpop.xlane.xlu0 %162 }
 0x18b   :  { %v175_v43 = vrot.slane %v163_v41, %v170_v40 }
 0x18d   :  { %v177_v44 = vsel %vm176_vm2, %v175_v43, %v171_v42 }
 0x18e   :  { %v180_v45 = vsel %vm179_vm3, %v177_v44, -inf }
 0x18f   :  { %181 = vmax.xlane.f32.xlu1 %v180_v45 }
 0x21c   :  { %v182_v48 = vpop.xlane.xlu1 %181 }
 0x21d   :  { %v187_v49 = vrot.slane %v182_v48, %v136_v23  ;;  %v191_v50 = vrot.slane %v182_v48, %v190_v47 }
 0x21f   :  { %v194_v51 = vsub.f32 %v160_v39, %v187_v49  ;;  %v195_v52 = vsub.f32 %v163_v41, %v191_v50 }
 0x221   :  { %v196_v53 = vmul.f32 1.442695, %v194_v51  ;;  %v198_v54 = vmul.f32 1.442695, %v195_v52 }
 0x223   :  { %327 = vpow2.f32 %v196_v53 }
 0x224   :  { %329 = vpow2.f32 %v198_v54 }
 0x22d   :  { %v328_v55 = vpop.eup %327 }
 0x22e   :  { %v330_v56 = vpop.eup %329  ;;  %203 = vperm.xlu1 %321, %v328_v55  }
 0x22f   :  { %206 = vperm.xlu0 %322, %v330_v56  }
 0x2ad   :  { %v204_v57 = vpop.permute.xlu1 %203 }
 0x2ae   :  { %v207_v58 = vpop.permute.xlu0 %206  ;;  %v211_v59 = vrot.slane %v204_v57, %v170_v40 }
 0x2af   :  { %v215_v60 = vrot.slane %v207_v58, %v170_v40 }
 0x2b1   :  { %v216_v61 = vsel %vm176_vm2, %v215_v60, %v211_v59 }
 0x2b2   :  { %v218_v62 = vsel %vm179_vm3, %v216_v61, 0.0 }
 0x2b3   :  { %219 = vadd.xlane.f32.xlu1 %v218_v62 }
 0x340   :  { %v220_v63 = vpop.xlane.xlu1 %219 }
 0x341   :  { %v225_v0 = vrot.slane %v220_v63, %v136_v23  ;;  %v229_v1 = vrot.slane %v220_v63, %v190_v47 }
 0x343   :  { %331 = vrcp.f32 %v225_v0 }
 0x344   :  { %333 = vrcp.f32 %v229_v1 }
 0x34d   :  { %v332_v2 = vpop.eup %331 }
 0x34e   :  { %v233_v3 = vmul.f32 %v332_v2, %v328_v55  ;;  %v334_v4 = vpop.eup %333 }
 0x34f   :  { %v235_v5 = vmul.f32 %v334_v4, %v330_v56 }
 0x350   :  { %239 = vperm.xlu0 %322, %v233_v3  }
 0x354   :  { %242 = vperm.xlu0 %322, %v235_v5  }
 0x3cf   :  { %v240_v6 = vpop.permute.xlu0 %239 }
 0x3d0   :  { %v247_v8 = vrot.slane %v240_v6, %v170_v40 }
 0x3d3   :  { %v243_v7 = vpop.permute.xlu0 %242 }
 0x3d4   :  { %v251_v9 = vrot.slane %v243_v7, %v170_v40 }
 0x3d6   :  { %v252_v10 = vsel %vm176_vm2, %v251_v9, %v247_v8 }
 0x3d7   :  { %254 = vst.msk [vmem:[#allocation2] sm:$0x3] %vm179_vm3, %v252_v10 }
 0x3d8   :  { %346 = shalt.err (!%p343_p4)
}
 0x3d9   :  { %s347_s14 = scalar_lea.hbm %s453_s4, 32 }
 0x3da   :  { %p348_p5 = scmp.ne.s32.totalorder %s453_s4, %s347_s14  ;;  %p351_p6 = scmp.lt.u32.totalorder %s347_s14, %s453_s4 }
 0x3dc   :  { %p353_p7 = pnand %p351_p6, %p348_p5 }
 0x3de   :  { %356 = shalt.err (!%p353_p7)
}
 0x3df   :  { %264 = dma.vmem_to_hbm [thread:$0]  %s262_s3, 32, %s453_s4, [#allocation3]  }
 0x3e0   :  { %357 = dma.done.wait [#allocation3], 32  }
 0x3e1   :  { %358 = vsyncadd [#allocation3], 4294967264 }
 0x3e2   :  { %268 = vsyncpa [#allocation3], 1 }

</bundles_post_ra>
